<compile_context>
chip_gen: v7x
topology: tpu7x:2x2x1
jax: 0.10.0
libtpu: 0.0.40
codegen_flags: <defaults>
</compile_context>

<pallas_src>
import jax
import jax.numpy as jnp
import numpy as np
from jax.experimental import pallas as pl
from jax.experimental.pallas import tpu as pltpu


def _conv3x3_rowtile_kernel(x_ref, wt_ref, b_ref, o_ref, pat_ref):
    """One (batch, row-tile) grid step of the 3x3 'same' conv.

    x_ref  : (1, H+2, W+2, Cin)  zero-padded NHWC image (resident per batch)
    wt_ref : (CoutT, 9*Cin)      conv weights, channel-major, tap order (dy, dx, c)
    b_ref  : (CoutT, 1)          bias
    o_ref  : (1, CoutT, TH*W)    channel-major output tile (lane-dense last dim)
    pat_ref: (TH, W, 9*Cin)      VMEM scratch: im2col buffer for this tile
    """
    TH, W, K = pat_ref.shape
    cin = x_ref.shape[3]
    t = pl.program_id(1)
    row0 = pl.multiple_of(t * TH, TH)  # top padded-row of this tile's window

    # Build the im2col buffer: one shifted (TH, W, Cin) window per 3x3 tap,
    # packed along the lane dim at offset (dy*3 + dx) * Cin.
    for dy in range(3):
        for dx in range(3):
            k0 = (dy * 3 + dx) * cin
            pat_ref[:, :, k0:k0 + cin] = x_ref[0, pl.ds(row0 + dy, TH), dx:dx + W, :]

    patches = pat_ref[...].reshape(TH * W, K)  # (TH*W, 9*Cin); W % 8 == 0

    # Single MXU matmul with a channel-major result so the store below is
    # lane-dense (last dim TH*W is a multiple of 128). The transpose feeds the
    # dot and gets folded into the matmul's dimension numbers.
    acc = jnp.dot(wt_ref[...], patches.T, preferred_element_type=jnp.float32)
    acc = acc + b_ref[...]  # (CoutT, TH*W) + (CoutT, 1)
    o_ref[0] = acc.astype(o_ref.dtype)


def _pick_row_tile(H, W):
    """Smallest row tile giving a 128-lane-aligned output tile (more grid steps)."""
    for th in (8, 16, 32, 64):
        if H % th == 0 and (th * W) % 128 == 0:
            return th
    return H  # whole image: block dims then equal the full array dims


def pixel_shuffle_imdn_block(x_nchw, weight, bias, upscale_factor):
    """conv3x3(stride=1, padding=1, bias) + PixelShuffle(r), PyTorch semantics.

    x_nchw: (N, Cin, H, W); weight: (Cout*r^2, Cin, 3, 3); bias: (Cout*r^2,)
    returns (N, Cout, H*r, W*r), float32.
    """
    r = upscale_factor
    N, Cin, H, W = x_nchw.shape
    CoutT = weight.shape[0]
    Cout = CoutT // (r * r)
    assert W % 8 == 0, "W must be a multiple of 8 for the in-kernel im2col reshape"

    # NHWC + zero pad of 1 in H and W (conv padding). This is one extra pass
    # over the *small* tensor; the large conv output never makes an extra HBM
    # round trip thanks to the kernel's channel-major output layout.
    x_nhwc = jnp.transpose(x_nchw, (0, 2, 3, 1)).astype(jnp.float32)
    x_pad = jnp.pad(x_nhwc, ((0, 0), (1, 1), (1, 1), (0, 0)))

    # (CoutT, Cin, 3, 3) -> (CoutT, 3, 3, Cin) -> (CoutT, 9*Cin); column order
    # matches the im2col buffer's (dy, dx, c) ordering.
    wt = jnp.transpose(weight, (0, 2, 3, 1)).reshape(CoutT, 9 * Cin).astype(jnp.float32)
    b2 = bias.reshape(CoutT, 1).astype(jnp.float32)

    TH = _pick_row_tile(H, W)
    grid = (N, H // TH)

    y = pl.pallas_call(
        _conv3x3_rowtile_kernel,
        out_shape=jax.ShapeDtypeStruct((N, CoutT, H * W), jnp.float32),
        grid_spec=pltpu.PrefetchScalarGridSpec(
            num_scalar_prefetch=0,
            grid=grid,
            in_specs=[
                # Full padded image, resident per batch (index ignores t).
                pl.BlockSpec((1, H + 2, W + 2, Cin), lambda n, t: (n, 0, 0, 0)),
                # Weights / bias: constant blocks, fetched once.
                pl.BlockSpec((CoutT, 9 * Cin), lambda n, t: (0, 0)),
                pl.BlockSpec((CoutT, 1), lambda n, t: (0, 0)),
            ],
            out_specs=pl.BlockSpec((1, CoutT, TH * W), lambda n, t: (n, 0, t)),
            scratch_shapes=[pltpu.VMEM((TH, W, 9 * Cin), jnp.float32)],
        ),
        compiler_params=pltpu.CompilerParams(
            dimension_semantics=("parallel", "parallel"),
            vmem_limit_bytes=48 * 1024 * 1024,
        ),
    )(x_pad, wt, b2)

    # PixelShuffle epilogue. The kernel output is already channel-major
    # (N, CoutT, H*W): the splits below are free reshapes; only the inherent
    # PixelShuffle transpose remains as one XLA op.
    # TODO(synk): fusing this (w,j)->lane interleave into the kernel requires a
    # sublane->lane relayout of the matmul tile that Mosaic does not lower
    # robustly today; it is intentionally left to XLA.
    y = y.reshape(N, Cout, r, r, H, W)
    y = jnp.transpose(y, (0, 1, 4, 2, 5, 3))  # (N, Cout, H, r, W, r)
    return y.reshape(N, Cout, H * r, W * r)


def _reference_forward(x_nchw, weight, bias, r):
    """Plain-JAX reference (lax conv + pixel shuffle) for correctness checking."""
    y = jax.lax.conv_general_dilated(
        x_nchw.astype(jnp.float32),
        weight.astype(jnp.float32),
        window_strides=(1, 1),
        padding="SAME",
        dimension_numbers=("NCHW", "OIHW", "NCHW"),
    ) + bias.reshape(1, -1, 1, 1)
    N, CR2, H, W = y.shape
    Cout = CR2 // (r * r)
    y = y.reshape(N, Cout, r, r, H, W)
    y = jnp.transpose(y, (0, 1, 4, 2, 5, 3))
    return y.reshape(N, Cout, H * r, W * r)


if __name__ == "__main__":
    # Small, module-consistent shapes.
    N, Cin, H, W = 2, 4, 16, 16
    Cout, r, k = 4, 2, 3
    CoutT = Cout * r * r

    key = jax.random.PRNGKey(0)
    kx, kw, kb = jax.random.split(key, 3)
    x = jax.random.normal(kx, (N, Cin, H, W), dtype=jnp.float32)
    fan_in = Cin * k * k
    weight = jax.random.normal(kw, (CoutT, Cin, k, k), dtype=jnp.float32) / np.sqrt(fan_in)
    bias = jax.random.normal(kb, (CoutT,), dtype=jnp.float32) * 0.01

    fwd = jax.jit(pixel_shuffle_imdn_block, static_argnums=(3,))
    out = jax.block_until_ready(fwd(x, weight, bias, r))
    ref = jax.block_until_ready(_reference_forward(x, weight, bias, r))

    assert out.shape == (N, Cout, H * r, W * r), out.shape
    np.testing.assert_allclose(np.asarray(out), np.asarray(ref), rtol=1e-4, atol=1e-4)
    print("KERNEL_OK")
</pallas_src>

<mosaic_0001>
module attributes {stable_mosaic.version = 11 : i64} {
  func.func @_conv3x3_rowtile_kernel(%arg0: i32, %arg1: i32, %arg2: memref<1x18x18x4xf32, #tpu.memory_space<vmem>>, %arg3: memref<16x36xf32, #tpu.memory_space<vmem>>, %arg4: memref<16x1xf32, #tpu.memory_space<vmem>>, %arg5: memref<1x16x128xf32, #tpu.memory_space<vmem>>, %arg6: memref<8x16x36xf32, #tpu.memory_space<vmem>>) attributes {dimension_semantics = [#tpu.dimension_semantics<parallel>, #tpu.dimension_semantics<parallel>], iteration_bounds = array<i64: 2, 2>, scalar_prefetch = 0 : i64, scratch_operands = 1 : i64, tpu.core_type = #tpu.core_type<tc>, window_params = [{transform_indices = @transform_0, window_bounds = array<i64: 1, 18, 18, 4>}, {pipeline_mode = #tpu.pipeline_mode<synchronous>, transform_indices = @transform_1, window_bounds = array<i64: 16, 36>}, {pipeline_mode = #tpu.pipeline_mode<synchronous>, transform_indices = @transform_2, window_bounds = array<i64: 16, 1>}, {transform_indices = @transform_3, window_bounds = array<i64: 1, 16, 128>}]} {
    %c8_i32 = arith.constant 8 : i32
    %0 = arith.muli %arg1, %c8_i32 : i32
    %1 = tpu.assume_multiple %0, 8 : i32
    %c0_i32 = arith.constant 0 : i32
    %2 = arith.addi %1, %c0_i32 : i32
    %c0 = arith.constant 0 : index
    %3 = arith.index_cast %2 : i32 to index
    %c0_0 = arith.constant 0 : index
    %c0_1 = arith.constant 0 : index
    %4 = vector.load %arg2[%c0, %3, %c0_0, %c0_1] : memref<1x18x18x4xf32, #tpu.memory_space<vmem>>, vector<1x8x16x4xf32>
    %5 = vector.shape_cast %4 : vector<1x8x16x4xf32> to vector<8x16x4xf32>
    %c0_2 = arith.constant 0 : index
    %c0_3 = arith.constant 0 : index
    %c0_4 = arith.constant 0 : index
    %6 = vector.load %arg6[%c0_2, %c0_3, %c0_4] : memref<8x16x36xf32, #tpu.memory_space<vmem>>, vector<8x16x4xf32>
    tpu.vector_store %arg6[%c0_2, %c0_3, %c0_4], %5 {strides = array<i32>} : memref<8x16x36xf32, #tpu.memory_space<vmem>>, vector<8x16x4xf32>,
    %c0_i32_5 = arith.constant 0 : i32
    %7 = arith.addi %1, %c0_i32_5 : i32
    %c0_6 = arith.constant 0 : index
    %8 = arith.index_cast %7 : i32 to index
    %c1 = arith.constant 1 : index
    %c0_7 = arith.constant 0 : index
    %9 = vector.load %arg2[%c0_6, %8, %c1, %c0_7] : memref<1x18x18x4xf32, #tpu.memory_space<vmem>>, vector<1x8x16x4xf32>
    %10 = vector.shape_cast %9 : vector<1x8x16x4xf32> to vector<8x16x4xf32>
    %c0_8 = arith.constant 0 : index
    %c0_9 = arith.constant 0 : index
    %c4 = arith.constant 4 : index
    %11 = vector.load %arg6[%c0_8, %c0_9, %c4] : memref<8x16x36xf32, #tpu.memory_space<vmem>>, vector<8x16x4xf32>
    tpu.vector_store %arg6[%c0_8, %c0_9, %c4], %10 {strides = array<i32>} : memref<8x16x36xf32, #tpu.memory_space<vmem>>, vector<8x16x4xf32>,
    %c0_i32_10 = arith.constant 0 : i32
    %12 = arith.addi %1, %c0_i32_10 : i32
    %c0_11 = arith.constant 0 : index
    %13 = arith.index_cast %12 : i32 to index
    %c2 = arith.constant 2 : index
    %c0_12 = arith.constant 0 : index
    %14 = vector.load %arg2[%c0_11, %13, %c2, %c0_12] : memref<1x18x18x4xf32, #tpu.memory_space<vmem>>, vector<1x8x16x4xf32>
    %15 = vector.shape_cast %14 : vector<1x8x16x4xf32> to vector<8x16x4xf32>
    %c0_13 = arith.constant 0 : index
    %c0_14 = arith.constant 0 : index
    %c8 = arith.constant 8 : index
    %16 = vector.load %arg6[%c0_13, %c0_14, %c8] : memref<8x16x36xf32, #tpu.memory_space<vmem>>, vector<8x16x4xf32>
    tpu.vector_store %arg6[%c0_13, %c0_14, %c8], %15 {strides = array<i32>} : memref<8x16x36xf32, #tpu.memory_space<vmem>>, vector<8x16x4xf32>,
    %c1_i32 = arith.constant 1 : i32
    %17 = arith.addi %1, %c1_i32 : i32
    %c0_15 = arith.constant 0 : index
    %18 = arith.index_cast %17 : i32 to index
    %c0_16 = arith.constant 0 : index
    %c0_17 = arith.constant 0 : index
    %19 = vector.load %arg2[%c0_15, %18, %c0_16, %c0_17] : memref<1x18x18x4xf32, #tpu.memory_space<vmem>>, vector<1x8x16x4xf32>
    %20 = vector.shape_cast %19 : vector<1x8x16x4xf32> to vector<8x16x4xf32>
    %c0_18 = arith.constant 0 : index
    %c0_19 = arith.constant 0 : index
    %c12 = arith.constant 12 : index
    %21 = vector.load %arg6[%c0_18, %c0_19, %c12] : memref<8x16x36xf32, #tpu.memory_space<vmem>>, vector<8x16x4xf32>
    tpu.vector_store %arg6[%c0_18, %c0_19, %c12], %20 {strides = array<i32>} : memref<8x16x36xf32, #tpu.memory_space<vmem>>, vector<8x16x4xf32>,
    %c1_i32_20 = arith.constant 1 : i32
    %22 = arith.addi %1, %c1_i32_20 : i32
    %c0_21 = arith.constant 0 : index
    %23 = arith.index_cast %22 : i32 to index
    %c1_22 = arith.constant 1 : index
    %c0_23 = arith.constant 0 : index
    %24 = vector.load %arg2[%c0_21, %23, %c1_22, %c0_23] : memref<1x18x18x4xf32, #tpu.memory_space<vmem>>, vector<1x8x16x4xf32>
    %25 = vector.shape_cast %24 : vector<1x8x16x4xf32> to vector<8x16x4xf32>
    %c0_24 = arith.constant 0 : index
    %c0_25 = arith.constant 0 : index
    %c16 = arith.constant 16 : index
    %26 = vector.load %arg6[%c0_24, %c0_25, %c16] : memref<8x16x36xf32, #tpu.memory_space<vmem>>, vector<8x16x4xf32>
    tpu.vector_store %arg6[%c0_24, %c0_25, %c16], %25 {strides = array<i32>} : memref<8x16x36xf32, #tpu.memory_space<vmem>>, vector<8x16x4xf32>,
    %c1_i32_26 = arith.constant 1 : i32
    %27 = arith.addi %1, %c1_i32_26 : i32
    %c0_27 = arith.constant 0 : index
    %28 = arith.index_cast %27 : i32 to index
    %c2_28 = arith.constant 2 : index
    %c0_29 = arith.constant 0 : index
    %29 = vector.load %arg2[%c0_27, %28, %c2_28, %c0_29] : memref<1x18x18x4xf32, #tpu.memory_space<vmem>>, vector<1x8x16x4xf32>
    %30 = vector.shape_cast %29 : vector<1x8x16x4xf32> to vector<8x16x4xf32>
    %c0_30 = arith.constant 0 : index
    %c0_31 = arith.constant 0 : index
    %c20 = arith.constant 20 : index
    %31 = vector.load %arg6[%c0_30, %c0_31, %c20] : memref<8x16x36xf32, #tpu.memory_space<vmem>>, vector<8x16x4xf32>
    tpu.vector_store %arg6[%c0_30, %c0_31, %c20], %30 {strides = array<i32>} : memref<8x16x36xf32, #tpu.memory_space<vmem>>, vector<8x16x4xf32>,
    %c2_i32 = arith.constant 2 : i32
    %32 = arith.addi %1, %c2_i32 : i32
    %c0_32 = arith.constant 0 : index
    %33 = arith.index_cast %32 : i32 to index
    %c0_33 = arith.constant 0 : index
    %c0_34 = arith.constant 0 : index
    %34 = vector.load %arg2[%c0_32, %33, %c0_33, %c0_34] : memref<1x18x18x4xf32, #tpu.memory_space<vmem>>, vector<1x8x16x4xf32>
    %35 = vector.shape_cast %34 : vector<1x8x16x4xf32> to vector<8x16x4xf32>
    %c0_35 = arith.constant 0 : index
    %c0_36 = arith.constant 0 : index
    %c24 = arith.constant 24 : index
    %36 = vector.load %arg6[%c0_35, %c0_36, %c24] : memref<8x16x36xf32, #tpu.memory_space<vmem>>, vector<8x16x4xf32>
    tpu.vector_store %arg6[%c0_35, %c0_36, %c24], %35 {strides = array<i32>} : memref<8x16x36xf32, #tpu.memory_space<vmem>>, vector<8x16x4xf32>,
    %c2_i32_37 = arith.constant 2 : i32
    %37 = arith.addi %1, %c2_i32_37 : i32
    %c0_38 = arith.constant 0 : index
    %38 = arith.index_cast %37 : i32 to index
    %c1_39 = arith.constant 1 : index
    %c0_40 = arith.constant 0 : index
    %39 = vector.load %arg2[%c0_38, %38, %c1_39, %c0_40] : memref<1x18x18x4xf32, #tpu.memory_space<vmem>>, vector<1x8x16x4xf32>
    %40 = vector.shape_cast %39 : vector<1x8x16x4xf32> to vector<8x16x4xf32>
    %c0_41 = arith.constant 0 : index
    %c0_42 = arith.constant 0 : index
    %c28 = arith.constant 28 : index
    %41 = vector.load %arg6[%c0_41, %c0_42, %c28] : memref<8x16x36xf32, #tpu.memory_space<vmem>>, vector<8x16x4xf32>
    tpu.vector_store %arg6[%c0_41, %c0_42, %c28], %40 {strides = array<i32>} : memref<8x16x36xf32, #tpu.memory_space<vmem>>, vector<8x16x4xf32>,
    %c2_i32_43 = arith.constant 2 : i32
    %42 = arith.addi %1, %c2_i32_43 : i32
    %c0_44 = arith.constant 0 : index
    %43 = arith.index_cast %42 : i32 to index
    %c2_45 = arith.constant 2 : index
    %c0_46 = arith.constant 0 : index
    %44 = vector.load %arg2[%c0_44, %43, %c2_45, %c0_46] : memref<1x18x18x4xf32, #tpu.memory_space<vmem>>, vector<1x8x16x4xf32>
    %45 = vector.shape_cast %44 : vector<1x8x16x4xf32> to vector<8x16x4xf32>
    %c0_47 = arith.constant 0 : index
    %c0_48 = arith.constant 0 : index
    %c32 = arith.constant 32 : index
    %46 = vector.load %arg6[%c0_47, %c0_48, %c32] : memref<8x16x36xf32, #tpu.memory_space<vmem>>, vector<8x16x4xf32>
    tpu.vector_store %arg6[%c0_47, %c0_48, %c32], %45 {strides = array<i32>} : memref<8x16x36xf32, #tpu.memory_space<vmem>>, vector<8x16x4xf32>,
    %c0_49 = arith.constant 0 : index
    %c0_50 = arith.constant 0 : index
    %c0_51 = arith.constant 0 : index
    %47 = vector.load %arg6[%c0_49, %c0_50, %c0_51] : memref<8x16x36xf32, #tpu.memory_space<vmem>>, vector<8x16x36xf32>
    %48 = vector.shape_cast %47 : vector<8x16x36xf32> to vector<128x36xf32>
    %c0_52 = arith.constant 0 : index
    %c0_53 = arith.constant 0 : index
    %49 = vector.load %arg3[%c0_52, %c0_53] : memref<16x36xf32, #tpu.memory_space<vmem>>, vector<16x36xf32>
    %50 = tpu.transpose %48, [1, 0] : vector<128x36xf32> -> vector<36x128xf32>
    %cst = arith.constant dense<0.000000e+00> : vector<16x128xf32>
    %51 = tpu.matmul %49, %50, %cst {dimension_numbers = #tpu.dot_dimension_numbers<[1], [0], [0], [1], [0, 0, 1, 1], [], []>} : vector<16x36xf32>, vector<36x128xf32>, vector<16x128xf32> -> vector<16x128xf32>
    %c0_54 = arith.constant 0 : index
    %c0_55 = arith.constant 0 : index
    %52 = vector.load %arg4[%c0_54, %c0_55] : memref<16x1xf32, #tpu.memory_space<vmem>>, vector<16x1xf32>
    %53 = vector.broadcast %52 : vector<16x1xf32> to vector<16x128xf32>
    %54 = arith.addf %51, %53 : vector<16x128xf32>
    %c0_56 = arith.constant 0 : index
    %c0_57 = arith.constant 0 : index
    %c0_58 = arith.constant 0 : index
    %55 = vector.load %arg5[%c0_56, %c0_57, %c0_58] : memref<1x16x128xf32, #tpu.memory_space<vmem>>, vector<1x16x128xf32>
    %56 = vector.shape_cast %55 : vector<1x16x128xf32> to vector<16x128xf32>
    %57 = vector.shape_cast %54 : vector<16x128xf32> to vector<1x16x128xf32>
    tpu.vector_store %arg5[%c0_56, %c0_57, %c0_58], %57 {strides = array<i32>} : memref<1x16x128xf32, #tpu.memory_space<vmem>>, vector<1x16x128xf32>,
    return
  }
  func.func @transform_0(%arg0: i32, %arg1: i32) -> (i32, i32, i32, i32) {
    %c0_i32 = arith.constant 0 : i32
    %c0_i32_0 = arith.constant 0 : i32
    %c0_i32_1 = arith.constant 0 : i32
    %c0_i32_2 = arith.constant 0 : i32
    return %arg0, %c0_i32, %c0_i32_0, %c0_i32_1 : i32, i32, i32, i32
  }
  func.func @transform_1(%arg0: i32, %arg1: i32) -> (i32, i32) {
    %c0_i32 = arith.constant 0 : i32
    %c0_i32_0 = arith.constant 0 : i32
    %c0_i32_1 = arith.constant 0 : i32
    return %c0_i32, %c0_i32_0 : i32, i32
  }
  func.func @transform_2(%arg0: i32, %arg1: i32) -> (i32, i32) {
    %c0_i32 = arith.constant 0 : i32
    %c0_i32_0 = arith.constant 0 : i32
    %c0_i32_1 = arith.constant 0 : i32
    return %c0_i32, %c0_i32_0 : i32, i32
  }
  func.func @transform_3(%arg0: i32, %arg1: i32) -> (i32, i32, i32) {
    %c0_i32 = arith.constant 0 : i32
    %c0_i32_0 = arith.constant 0 : i32
    return %arg0, %c0_i32, %arg1 : i32, i32, i32
  }
}

</mosaic_0001>

<bundles_post_ra>
// kernel: pixel_shuffle_imdn_block.1
= control target key start
LH: loop header
LB: loop body
LE: loop exit
PB: predicated region body
PF: predicated region fallthrough
CT: control target
= control target key end

     0   :  { %s1666_s12 = smov 0   ;;  %s1668_s13 = smov 0   ;;  %s2256_s0 = inlined_call_operand.vmem [shape: f32[2,18,18,4], index: 0, kind: input, shape index: {}]   ;;  %s2257_s1 = inlined_call_operand.vmem [shape: f32[16,36], index: 1, kind: input, shape index: {}]   ;;  %s2258_s2 = inlined_call_operand.vmem [shape: f32[16,1], index: 2, kind: input, shape index: {}]   ;;  %s2259_s3 = inlined_call_operand.vmem [shape: f32[2,16,256], index: 3, kind: output, shape index: {}]  }
   0x1   :  { %s1670_s14 = smov 0   ;;  %s1672_s15 = smov 0  }
   0x2   :  { %s1674_s16 = smov 0   ;;  %s1676_s17 = smov 0  }
   0x3   :  { %s1678_s18 = smov 0  }
   0x4 LB: > { %s22_s19 = sadd.s32 1, %s1627_s16  ;;  %s25_s20 = sadd.s32 1, %s1631_s17  ;;  %s1635_s18 = sphi %s1678_s18, %s13_s18   ;;  %s1631_s17 = sphi %s1676_s17, %s2268_s17   ;;  %s1627_s16 = sphi %s1674_s16, %s2267_s16   ;;  %s1623_s15 = sphi %s1672_s15, %s2266_s15   ;;  %s1619_s14 = sphi %s1670_s14, %s2265_s14   ;;  %s1615_s13 = sphi %s1668_s13, %s2264_s13   ;;  %s1611_s12 = sphi %s1666_s12, %s2263_s12  }
   0x5   : > { %p23_p0 = scmp.ge.s32.totalorder %s22_s19, 2  ;;  %s1280_s21 = sadd.s32 4294967295, %s1635_s18  }
   0x6   : > { %p112_p1 = scmp.ne.s32.totalorder %s1615_s13, %s1611_s12  ;;  %p113_p2 = scmp.eq.s32.totalorder %s1280_s21, 3 }
   0x7   : > { %s2270_s19 = smov (%p23_p0, %s22_s19), 0  ;;  %s2272_s20 = smov (!%p23_p0, %s25_s20), %s1631_s17 }
   0x8   : > { %s98_s22 = ssub.s32 %s1627_s16, %s2270_s19  ;;  %p27_p3 = scmp.ge.s32.totalorder %s2272_s20, 2 }
   0x9   : > { %p1284_p4 = scmp.ge.s32.totalorder %s1635_s18, 1  ;;  %p1712_p5 = por %p113_p2, %p112_p1 }
   0xa   : > { %p151_p6 = scmp.lt.s32.totalorder %s1635_s18, 5  ;;  %s2274_s20 = smov (%p27_p3, %s2272_s20), 0 }
   0xb   : > { %s97_s24 = ssub.s32 %s1631_s17, %s2274_s20  ;;  %s102_s26 = sadd.s32 1, %s1615_s13 }
   0xc   : > { %p152_p7 = pnand %p1284_p4, %p151_p6  ;;  %s99_s25 = sor.u32 %s98_s22, %s97_s24 }
   0xd   : > { %p100_p8 = scmp.eq.s32.totalorder %s99_s25, 0  ;;  %p174_p9 = scmp.lt.s32.totalorder (!%p152_p7), %s1623_s15, 1  ;;  %vm198_vm0 = vcmask (!%p152_p7), 31744   ;;  %vm295_vm1 = vcmask (!%p152_p7), 64544   ;;  %vm392_vm2 = vcmask (!%p152_p7), 97344   ;;  %vm492_vm3 = vcmask (!%p152_p7), 130144  }
   0xe   : > { %155 = sbr.rel (%p152_p7) target bundleno = 638 (0x27e), region = 32  ;;  %s1637_s8 = smov (!%p152_p7), 8   ;;  %vm589_vm4 = vcmask (!%p152_p7), 162944   ;;  %vm686_vm5 = vcmask (!%p152_p7), 195744   ;;  %vm786_vm6 = vcmask (!%p152_p7), 228544   ;;  %vm883_vm7 = vcmask (!%p152_p7), 261344  }
   0xf   : > { %s1723_s27 = scalar_select %p100_p8, %s1615_s13, %s102_s26  }
  0x10   : > { %s1288_s29 = smul.u32 (!%p152_p7), 192, %s1619_s14  ;;  %s1638_s9 = smov (!%p152_p7), 4   ;;  %vm980_vm8 = vcmask (!%p152_p7), 294144   ;;  %vm1027_vm9 = vcmask (!%p152_p7), 293888  }
  0x11   : > { %s1639_s10 = smov (!%p152_p7), 12   ;;  %s1640_s11 = smov (!%p152_p7), 16   ;;  %vm1951_vm10 = vmpackc.low (!%p152_p7), %vm1027_vm9, %vm1027_vm9 }
  0x12   : > { %s1641_s21 = smov (!%p152_p7), 20   ;;  %s1642_s22 = smov (!%p152_p7), 24  }
  0x13   : > { %s1643_s24 = smov (!%p152_p7), 28   ;;  %s1644_s25 = smov (!%p152_p7), 32  }
  0x15   : > { %s175_s28 = scalar_select %p174_p9, %s1623_s15, 1 }
  0x17   : > { %s1513_s30 = smul.u32 432, %s175_s28 }
  0x19   : > { %s178_s6 = scalar_lea.vmem %s2256_s0, %s1513_s30 }
  0x1a   : > { %s1731_s7 = scalar_lea.vmem %s178_s6, %s1288_s29 }
  0x1b   : > { %v312_v0 = vld [vmem:[%s1731_s7 + $0x2] sm:$0xff]  ;;  %v313_v3 = vld [vmem:[%s1731_s7 + $0xa] sm:$0xff]  ;;  %v1291_v5 = vld [vmem:[%s1731_s7 + $0x18] sm:$0xff] }
  0x1c   : > { %v215_v1 = vld [vmem:[%s1731_s7 + $0x1] sm:$0xff]  ;;  %344 = vrot.lane.b32.xlu1 %v312_v0, %s1637_s8  ;;  %v216_v4 = vld [vmem:[%s1731_s7 + $0x9] sm:$0xff]  ;;  %v1342_v6 = vld [vmem:[%s1731_s7 + $0x38] sm:$0xff]  ;;  %201 = vst.msk [vmem:[#allocation2 + $0x10] sm:$0xff] %vm198_vm0, %v1291_v5 }
  0x1d   : > { %247 = vrot.lane.b32.xlu0 %v215_v1, %s1638_s9  ;;  %v1292_v2 = vld [vmem:[%s1731_s7 + $0x20] sm:$0xff]  ;;  %v1341_v7 = vld [vmem:[%s1731_s7 + $0x30] sm:$0xff]  ;;  %204 = vst.msk [vmem:[#allocation2 + $0x28] sm:$0xff] %vm198_vm0, %v1342_v6  ;;  %v1753_v9 = vld [vmem:[%s1731_s7 + $0x48] sm:$0xff] }
  0x1e   : > { %202 = vst.msk [vmem:[#allocation2 + $0x18] sm:$0xff] %vm198_vm0, %v1292_v2  ;;  %203 = vst.msk [vmem:[#allocation2 + $0x20] sm:$0xff] %vm198_vm0, %v1341_v7  ;;  %v1750_v8 = vld [vmem:[%s1731_s7 + $0x50] sm:$0xff]  ;;  %v1760_v10 = vld [vmem:[%s1731_s7 + $0x68] sm:$0xff] }
  0x1f   : > { %206 = vst.msk [vmem:[#allocation2 + $0x38] sm:$0xff] %vm198_vm0, %v1750_v8  ;;  %205 = vst.msk [vmem:[#allocation2 + $0x30] sm:$0xff] %vm198_vm0, %v1753_v9  ;;  %v1763_v11 = vld [vmem:[%s1731_s7 + $0x60] sm:$0xff]  ;;  %v1779_v16 = vld [vmem:[%s1731_s7 + $0x78] sm:$0xff] }
  0x20   : > { %346 = vrot.lane.b32.xlu1 %v313_v3, %s1637_s8  ;;  %v1308_v12 = vld [vmem:[%s1731_s7 + $0x21] sm:$0xff]  ;;  %208 = vst.msk [vmem:[#allocation2 + $0x48] sm:$0xff] %vm198_vm0, %v1760_v10  ;;  %207 = vst.msk [vmem:[#allocation2 + $0x40] sm:$0xff] %vm198_vm0, %v1763_v11  ;;  %v1307_v13 = vld [vmem:[%s1731_s7 + $0x19] sm:$0xff] }
  0x21   : > { %249 = vrot.lane.b32.xlu0 %v216_v4, %s1638_s9  ;;  %v182_v14 = vld [vmem:[%s1731_s7] sm:$0xff]  ;;  %v183_v17 = vld [vmem:[%s1731_s7 + $0x8] sm:$0xff]  ;;  %209 = vst.msk [vmem:[#allocation2 + $0x50] sm:$0xff] %vm198_vm0, %v1779_v16  ;;  %v1794_v20 = vld [vmem:[%s1731_s7 + $0x98] sm:$0xff] }
  0x22   : > { %v1775_v15 = vld [vmem:[%s1731_s7 + $0x80] sm:$0xff]  ;;  %199 = vst.msk [vmem:[#allocation2] sm:$0xff] %vm198_vm0, %v182_v14  ;;  %200 = vst.msk [vmem:[#allocation2 + $0x8] sm:$0xff] %vm198_vm0, %v183_v17  ;;  %v1797_v21 = vld [vmem:[%s1731_s7 + $0x90] sm:$0xff] }
  0x23   : > { %210 = vst.msk [vmem:[#allocation2 + $0x58] sm:$0xff] %vm198_vm0, %v1775_v15  ;;  %v1324_v18 = vld [vmem:[%s1731_s7 + $0x22] sm:$0xff]  ;;  %v1323_v19 = vld [vmem:[%s1731_s7 + $0x1a] sm:$0xff]  ;;  %212 = vst.msk [vmem:[#allocation2 + $0x68] sm:$0xff] %vm198_vm0, %v1794_v20 }
  0x24   : > { %446 = vrot.lane.b32.xlu1 %v1292_v2, %s1639_s10  ;;  %211 = vst.msk [vmem:[#allocation2 + $0x60] sm:$0xff] %vm198_vm0, %v1797_v21  ;;  %v1358_v22 = vld [vmem:[%s1731_s7 + $0x39] sm:$0xff]  ;;  %v1357_v23 = vld [vmem:[%s1731_s7 + $0x31] sm:$0xff]  ;;  %v1827_v27 = vld [vmem:[%s1731_s7 + $0xa8] sm:$0xff] }
  0x25   : > { %444 = vrot.lane.b32.xlu0 %v1291_v5, %s1639_s10  ;;  %v1374_v24 = vld [vmem:[%s1731_s7 + $0x3a] sm:$0xff]  ;;  %v1373_v25 = vld [vmem:[%s1731_s7 + $0x32] sm:$0xff]  ;;  %213 = vst.msk [vmem:[#allocation2 + $0x70] sm:$0xff] %vm198_vm0, %v1827_v27  ;;  %v1359_v29 = vld [vmem:[%s1731_s7 + $0x49] sm:$0xff] }
  0x26   : > { %v1824_v26 = vld [vmem:[%s1731_s7 + $0xb0] sm:$0xff]  ;;  %v1361_v33 = vld [vmem:[%s1731_s7 + $0x61] sm:$0xff]  ;;  %v1891_v39 = vld [vmem:[%s1731_s7 + $0x79] sm:$0xff] }
  0x27   : > { %214 = vst.msk [vmem:[#allocation2 + $0x78] sm:$0xff] %vm198_vm0, %v1824_v26  ;;  %v1360_v28 = vld [vmem:[%s1731_s7 + $0x51] sm:$0xff]  ;;  %v1362_v32 = vld [vmem:[%s1731_s7 + $0x69] sm:$0xff]  ;;  %v1888_v38 = vld [vmem:[%s1731_s7 + $0x81] sm:$0xff] }
  0x28   : > { %543 = vrot.lane.b32.xlu1 %v1308_v12, %s1640_s11  ;;  %v1376_v30 = vld [vmem:[%s1731_s7 + $0x52] sm:$0xff]  ;;  %v1375_v31 = vld [vmem:[%s1731_s7 + $0x4a] sm:$0xff]  ;;  %v1377_v35 = vld [vmem:[%s1731_s7 + $0x62] sm:$0xff] }
  0x29   : > { %541 = vrot.lane.b32.xlu0 %v1307_v13, %s1640_s11  ;;  %v1378_v34 = vld [vmem:[%s1731_s7 + $0x6a] sm:$0xff]  ;;  %v1900_v42 = vld [vmem:[%s1731_s7 + $0x82] sm:$0xff]  ;;  %v1903_v43 = vld [vmem:[%s1731_s7 + $0x7a] sm:$0xff] }
  0x2a   : > { %v1944_v58 = vld [vmem:[%s1731_s7 + $0x99] sm:$0xff]  ;;  %v1947_v59 = vld [vmem:[%s1731_s7 + $0x91] sm:$0xff] }
  0x2b   : > { %v1964_v2 = vld [vmem:[%s1731_s7 + $0x9a] sm:$0xff]  ;;  %v1967_v3 = vld [vmem:[%s1731_s7 + $0x92] sm:$0xff] }
  0x2c   : > { %640 = vrot.lane.b32.xlu1 %v1324_v18, %s1641_s21 }
  0x2d   : > { %638 = vrot.lane.b32.xlu0 %v1323_v19, %s1641_s21 }
  0x30   : > { %740 = vrot.lane.b32.xlu1 %v1342_v6, %s1642_s22 }
  0x31   : > { %738 = vrot.lane.b32.xlu0 %v1341_v7, %s1642_s22 }
  0x34   : > { %837 = vrot.lane.b32.xlu1 %v1358_v22, %s1643_s24 }
  0x35   : > { %835 = vrot.lane.b32.xlu0 %v1357_v23, %s1643_s24 }
  0x38   : > { %934 = vrot.lane.b32.xlu1 %v1374_v24, %s1644_s25 }
  0x39   : > { %932 = vrot.lane.b32.xlu0 %v1373_v25, %s1644_s25 }
  0x3c   : > { %253 = vrot.lane.b32.xlu1 %v1308_v12, %s1638_s9 }
  0x3d   : > { %251 = vrot.lane.b32.xlu0 %v1307_v13, %s1638_s9 }
  0x40   : > { %350 = vrot.lane.b32.xlu1 %v1324_v18, %s1637_s8  ;;  %v2014_v18 = vld [vmem:[%s1731_s7 + $0xb1] sm:$0xff] }
  0x41   : > { %348 = vrot.lane.b32.xlu0 %v1323_v19, %s1637_s8  ;;  %v2017_v19 = vld [vmem:[%s1731_s7 + $0xa9] sm:$0xff] }
  0x44   : > { %450 = vrot.lane.b32.xlu1 %v1342_v6, %s1639_s10 }
  0x45   : > { %448 = vrot.lane.b32.xlu0 %v1341_v7, %s1639_s10 }
  0x48   : > { %547 = vrot.lane.b32.xlu1 %v1358_v22, %s1640_s11 }
  0x49   : > { %545 = vrot.lane.b32.xlu0 %v1357_v23, %s1640_s11 }
  0x4c   : > { %644 = vrot.lane.b32.xlu1 %v1374_v24, %s1641_s21 }
  0x4d   : > { %642 = vrot.lane.b32.xlu0 %v1373_v25, %s1641_s21 }
  0x50   : > { %744 = vrot.lane.b32.xlu1 %v1750_v8, %s1642_s22 }
  0x51   : > { %742 = vrot.lane.b32.xlu0 %v1753_v9, %s1642_s22 }
  0x54   : > { %841 = vrot.lane.b32.xlu1 %v1360_v28, %s1643_s24 }
  0x55   : > { %839 = vrot.lane.b32.xlu0 %v1359_v29, %s1643_s24 }
  0x58   : > { %938 = vrot.lane.b32.xlu1 %v1376_v30, %s1644_s25 }
  0x59   : > { %936 = vrot.lane.b32.xlu0 %v1375_v31, %s1644_s25 }
  0x5c   : > { %257 = vrot.lane.b32.xlu1 %v1358_v22, %s1638_s9 }
  0x5d   : > { %255 = vrot.lane.b32.xlu0 %v1357_v23, %s1638_s9 }
  0x60   : > { %354 = vrot.lane.b32.xlu1 %v1374_v24, %s1637_s8 }
  0x61   : > { %352 = vrot.lane.b32.xlu0 %v1373_v25, %s1637_s8  ;;  %v2028_v25 = vld [vmem:[%s1731_s7 + $0xb2] sm:$0xff] }
  0x64   : > { %454 = vrot.lane.b32.xlu1 %v1750_v8, %s1639_s10 }
  0x65   : > { %452 = vrot.lane.b32.xlu0 %v1753_v9, %s1639_s10 }
  0x68   : > { %551 = vrot.lane.b32.xlu1 %v1360_v28, %s1640_s11 }
  0x69   : > { %549 = vrot.lane.b32.xlu0 %v1359_v29, %s1640_s11 }
  0x6c   : > { %648 = vrot.lane.b32.xlu1 %v1376_v30, %s1641_s21 }
  0x6d   : > { %646 = vrot.lane.b32.xlu0 %v1375_v31, %s1641_s21 }
  0x70   : > { %748 = vrot.lane.b32.xlu1 %v1760_v10, %s1642_s22 }
  0x71   : > { %746 = vrot.lane.b32.xlu0 %v1763_v11, %s1642_s22 }
  0x74   : > { %845 = vrot.lane.b32.xlu1 %v1362_v32, %s1643_s24 }
  0x75   : > { %843 = vrot.lane.b32.xlu0 %v1361_v33, %s1643_s24 }
  0x78   : > { %942 = vrot.lane.b32.xlu1 %v1378_v34, %s1644_s25 }
  0x79   : > { %940 = vrot.lane.b32.xlu0 %v1377_v35, %s1644_s25 }
  0x7c   : > { %261 = vrot.lane.b32.xlu1 %v1360_v28, %s1638_s9  ;;  %v2031_v28 = vld [vmem:[%s1731_s7 + $0xaa] sm:$0xff] }
  0x7d   : > { %259 = vrot.lane.b32.xlu0 %v1359_v29, %s1638_s9 }
  0x80   : > { %358 = vrot.lane.b32.xlu1 %v1376_v30, %s1637_s8 }
  0x81   : > { %356 = vrot.lane.b32.xlu0 %v1375_v31, %s1637_s8 }
  0x84   : > { %458 = vrot.lane.b32.xlu1 %v1760_v10, %s1639_s10 }
  0x85   : > { %456 = vrot.lane.b32.xlu0 %v1763_v11, %s1639_s10 }
  0x88   : > { %555 = vrot.lane.b32.xlu1 %v1362_v32, %s1640_s11 }
  0x89   : > { %553 = vrot.lane.b32.xlu0 %v1361_v33, %s1640_s11 }
  0x8c   : > { %652 = vrot.lane.b32.xlu1 %v1378_v34, %s1641_s21 }
  0x8d   : > { %650 = vrot.lane.b32.xlu0 %v1377_v35, %s1641_s21 }
  0x8e   : > { %v345_v36 = vpop.permute.xlu1 %344 }
  0x8f   : > { %v248_v37 = vpop.permute.xlu0 %247 }
  0x90   : > { %296 = vst.msk [vmem:[#allocation2] sm:$0xff] %vm295_vm1, %v248_v37  ;;  %752 = vrot.lane.b32.xlu1 %v1775_v15, %s1642_s22 }
  0x91   : > { %750 = vrot.lane.b32.xlu0 %v1779_v16, %s1642_s22  ;;  %393 = vst.msk [vmem:[#allocation2] sm:$0xff] %vm392_vm2, %v345_v36 }
  0x92   : > { %v347_v40 = vpop.permute.xlu1 %346 }
  0x93   : > { %v250_v41 = vpop.permute.xlu0 %249 }
  0x94   : > { %297 = vst.msk [vmem:[#allocation2 + $0x8] sm:$0xff] %vm295_vm1, %v250_v41  ;;  %849 = vrot.lane.b32.xlu1 %v1888_v38, %s1643_s24 }
  0x95   : > { %847 = vrot.lane.b32.xlu0 %v1891_v39, %s1643_s24  ;;  %394 = vst.msk [vmem:[#allocation2 + $0x8] sm:$0xff] %vm392_vm2, %v347_v40 }
  0x96   : > { %v447_v44 = vpop.permute.xlu1 %446 }
  0x97   : > { %v445_v45 = vpop.permute.xlu0 %444  ;;  %494 = vst.msk [vmem:[#allocation2 + $0x8] sm:$0xff] %vm492_vm3, %v447_v44  ;;  %v1369_v44 = vld [vmem:[%s1731_s7 + $0xc1] sm:$0xff] }
  0x98   : > { %493 = vst.msk [vmem:[#allocation2] sm:$0xff] %vm492_vm3, %v445_v45  ;;  %946 = vrot.lane.b32.xlu1 %v1900_v42, %s1644_s25 }
  0x99   : > { %944 = vrot.lane.b32.xlu0 %v1903_v43, %s1644_s25 }
  0x9a   : > { %v544_v46 = vpop.permute.xlu1 %543 }
  0x9b   : > { %v542_v47 = vpop.permute.xlu0 %541  ;;  %591 = vst.msk [vmem:[#allocation2 + $0x8] sm:$0xff] %vm589_vm4, %v544_v46 }
  0x9c   : > { %590 = vst.msk [vmem:[#allocation2] sm:$0xff] %vm589_vm4, %v542_v47  ;;  %265 = vrot.lane.b32.xlu1 %v1362_v32, %s1638_s9 }
  0x9d   : > { %263 = vrot.lane.b32.xlu0 %v1361_v33, %s1638_s9 }
  0x9e   : > { %v641_v48 = vpop.permute.xlu1 %640 }
  0x9f   : > { %v639_v49 = vpop.permute.xlu0 %638  ;;  %688 = vst.msk [vmem:[#allocation2 + $0x8] sm:$0xff] %vm686_vm5, %v641_v48 }
  0xa0   : > { %687 = vst.msk [vmem:[#allocation2] sm:$0xff] %vm686_vm5, %v639_v49  ;;  %362 = vrot.lane.b32.xlu1 %v1378_v34, %s1637_s8 }
  0xa1   : > { %360 = vrot.lane.b32.xlu0 %v1377_v35, %s1637_s8 }
  0xa2   : > { %v741_v50 = vpop.permute.xlu1 %740 }
  0xa3   : > { %v739_v51 = vpop.permute.xlu0 %738  ;;  %788 = vst.msk [vmem:[#allocation2 + $0x8] sm:$0xff] %vm786_vm6, %v741_v50  ;;  %v1386_v50 = vld [vmem:[%s1731_s7 + $0xca] sm:$0xff] }
  0xa4   : > { %787 = vst.msk [vmem:[#allocation2] sm:$0xff] %vm786_vm6, %v739_v51  ;;  %462 = vrot.lane.b32.xlu1 %v1775_v15, %s1639_s10  ;;  %v1385_v51 = vld [vmem:[%s1731_s7 + $0xc2] sm:$0xff] }
  0xa5   : > { %460 = vrot.lane.b32.xlu0 %v1779_v16, %s1639_s10 }
  0xa6   : > { %v838_v52 = vpop.permute.xlu1 %837 }
  0xa7   : > { %v836_v53 = vpop.permute.xlu0 %835  ;;  %885 = vst.msk [vmem:[#allocation2 + $0x8] sm:$0xff] %vm883_vm7, %v838_v52 }
  0xa8   : > { %884 = vst.msk [vmem:[#allocation2] sm:$0xff] %vm883_vm7, %v836_v53  ;;  %559 = vrot.lane.b32.xlu1 %v1888_v38, %s1640_s11 }
  0xa9   : > { %557 = vrot.lane.b32.xlu0 %v1891_v39, %s1640_s11 }
  0xaa   : > { %v935_v54 = vpop.permute.xlu1 %934 }
  0xab   : > { %v933_v55 = vpop.permute.xlu0 %932  ;;  %982 = vst.msk [vmem:[#allocation2 + $0x8] sm:$0xff] %vm980_vm8, %v935_v54 }
  0xac   : > { %981 = vst.msk [vmem:[#allocation2] sm:$0xff] %vm980_vm8, %v933_v55  ;;  %656 = vrot.lane.b32.xlu1 %v1900_v42, %s1641_s21 }
  0xad   : > { %654 = vrot.lane.b32.xlu0 %v1903_v43, %s1641_s21 }
  0xae   : > { %v254_v56 = vpop.permute.xlu1 %253 }
  0xaf   : > { %v252_v57 = vpop.permute.xlu0 %251  ;;  %299 = vst.msk [vmem:[#allocation2 + $0x18] sm:$0xff] %vm295_vm1, %v254_v56 }
  0xb0   : > { %298 = vst.msk [vmem:[#allocation2 + $0x10] sm:$0xff] %vm295_vm1, %v252_v57  ;;  %756 = vrot.lane.b32.xlu1 %v1794_v20, %s1642_s22 }
  0xb1   : > { %754 = vrot.lane.b32.xlu0 %v1797_v21, %s1642_s22 }
  0xb2   : > { %v351_v60 = vpop.permute.xlu1 %350  ;;  %v998_v63 = vld [vmem:[#allocation2 + $0x8] sm:$0xff] }
  0xb3   : > { %v349_v61 = vpop.permute.xlu0 %348  ;;  %v997_v62 = vld [vmem:[#allocation2] sm:$0xff]  ;;  %396 = vst.msk [vmem:[#allocation2 + $0x18] sm:$0xff] %vm392_vm2, %v351_v60 }
  0xb4   : > { %395 = vst.msk [vmem:[#allocation2 + $0x10] sm:$0xff] %vm392_vm2, %v349_v61  ;;  %v1465_v1 = vpack.c.bf16 %v998_v63, %v997_v62  ;;  %853 = vrot.lane.b32.xlu1 %v1944_v58, %s1643_s24 }
  0xb5   : > { %851 = vrot.lane.b32.xlu0 %v1947_v59, %s1643_s24 }
  0xb6   : > { %1467 = vmatprep.subr.msk.bf16.mxu0 %vm1951_vm10, %v1465_v1  ;;  %v451_v4 = vpop.permute.xlu1 %450 }
  0xb7   : > { %v449_v5 = vpop.permute.xlu0 %448  ;;  %1470 = vmatpush3.bf16.xpose.msk.msra.mxu0 %vm1951_vm10, %v1465_v1  ;;  %496 = vst.msk [vmem:[#allocation2 + $0x18] sm:$0xff] %vm492_vm3, %v451_v4  ;;  %v1356_v1 = vld [vmem:[%s1731_s7 + $0xe0] sm:$0xff] }
  0xb8   : > { %495 = vst.msk [vmem:[#allocation2 + $0x10] sm:$0xff] %vm492_vm3, %v449_v5  ;;  %950 = vrot.lane.b32.xlu1 %v1964_v2, %s1644_s25  ;;  %v1372_v5 = vld [vmem:[%s1731_s7 + $0xe1] sm:$0xff] }
  0xb9   : > { %948 = vrot.lane.b32.xlu0 %v1967_v3, %s1644_s25 }
  0xba   : > { %v548_v6 = vpop.permute.xlu1 %547 }
  0xbb   : > { %v546_v7 = vpop.permute.xlu0 %545  ;;  %593 = vst.msk [vmem:[#allocation2 + $0x18] sm:$0xff] %vm589_vm4, %v548_v6  ;;  %v1371_v6 = vld [vmem:[%s1731_s7 + $0xd9] sm:$0xff] }
  0xbc   : > { %592 = vst.msk [vmem:[#allocation2 + $0x10] sm:$0xff] %vm589_vm4, %v546_v7  ;;  %269 = vrot.lane.b32.xlu1 %v1888_v38, %s1638_s9 }
  0xbd   : > { %267 = vrot.lane.b32.xlu0 %v1891_v39, %s1638_s9 }
  0xbe   : > { %v645_v8 = vpop.permute.xlu1 %644 }
  0xbf   : > { %v643_v9 = vpop.permute.xlu0 %642  ;;  %690 = vst.msk [vmem:[#allocation2 + $0x18] sm:$0xff] %vm686_vm5, %v645_v8 }
  0xc0   : > { %689 = vst.msk [vmem:[#allocation2 + $0x10] sm:$0xff] %vm686_vm5, %v643_v9  ;;  %366 = vrot.lane.b32.xlu1 %v1900_v42, %s1637_s8 }
  0xc1   : > { %364 = vrot.lane.b32.xlu0 %v1903_v43, %s1637_s8  ;;  %v1370_v43 = vld [vmem:[%s1731_s7 + $0xc9] sm:$0xff] }
  0xc2   : > { %v745_v10 = vpop.permute.xlu1 %744 }
  0xc3   : > { %v743_v11 = vpop.permute.xlu0 %742  ;;  %790 = vst.msk [vmem:[#allocation2 + $0x18] sm:$0xff] %vm786_vm6, %v745_v10 }
  0xc4   : > { %789 = vst.msk [vmem:[#allocation2 + $0x10] sm:$0xff] %vm786_vm6, %v743_v11  ;;  %466 = vrot.lane.b32.xlu1 %v1794_v20, %s1639_s10 }
  0xc5   : > { %464 = vrot.lane.b32.xlu0 %v1797_v21, %s1639_s10 }
  0xc6   : > { %v842_v12 = vpop.permute.xlu1 %841 }
  0xc7   : > { %v840_v13 = vpop.permute.xlu0 %839  ;;  %887 = vst.msk [vmem:[#allocation2 + $0x18] sm:$0xff] %vm883_vm7, %v842_v12  ;;  %v1388_v12 = vld [vmem:[%s1731_s7 + $0xe2] sm:$0xff] }
  0xc8   : > { %886 = vst.msk [vmem:[#allocation2 + $0x10] sm:$0xff] %vm883_vm7, %v840_v13  ;;  %563 = vrot.lane.b32.xlu1 %v1944_v58, %s1640_s11  ;;  %v1387_v13 = vld [vmem:[%s1731_s7 + $0xda] sm:$0xff] }
  0xc9   : > { %561 = vrot.lane.b32.xlu0 %v1947_v59, %s1640_s11 }
  0xca   : > { %v939_v14 = vpop.permute.xlu1 %938 }
  0xcb   : > { %v937_v15 = vpop.permute.xlu0 %936  ;;  %984 = vst.msk [vmem:[#allocation2 + $0x18] sm:$0xff] %vm980_vm8, %v939_v14 }
  0xcc   : > { %983 = vst.msk [vmem:[#allocation2 + $0x10] sm:$0xff] %vm980_vm8, %v937_v15  ;;  %660 = vrot.lane.b32.xlu1 %v1964_v2, %s1641_s21 }
  0xcd   : > { %658 = vrot.lane.b32.xlu0 %v1967_v3, %s1641_s21 }
  0xce   : > { %v258_v16 = vpop.permute.xlu1 %257 }
  0xcf   : > { %v256_v17 = vpop.permute.xlu0 %255  ;;  %301 = vst.msk [vmem:[#allocation2 + $0x28] sm:$0xff] %vm295_vm1, %v258_v16  ;;  %v1013_v16 = vld [vmem:[%s2257_s1] sm:$0xff] }
  0xd0   : > { %300 = vst.msk [vmem:[#allocation2 + $0x20] sm:$0xff] %vm295_vm1, %v256_v17  ;;  %760 = vrot.lane.b32.xlu1 %v1824_v26, %s1642_s22  ;;  %1462 = vmatprep.mubr.msk.f32.mxu0 %vm1027_vm9, %v1013_v16 }
  0xd1   : > { %758 = vrot.lane.b32.xlu0 %v1827_v27, %s1642_s22 }
  0xd2   : > { %v355_v20 = vpop.permute.xlu1 %354  ;;  %v1000_v23 = vld [vmem:[#allocation2 + $0x18] sm:$0xff] }
  0xd3   : > { %v353_v21 = vpop.permute.xlu0 %352  ;;  %v999_v22 = vld [vmem:[#allocation2 + $0x10] sm:$0xff]  ;;  %398 = vst.msk [vmem:[#allocation2 + $0x28] sm:$0xff] %vm392_vm2, %v355_v20  ;;  %v1015_v20 = vld [vmem:[%s2258_s2] sm:$0xff] }
  0xd4   : > { %397 = vst.msk [vmem:[#allocation2 + $0x20] sm:$0xff] %vm392_vm2, %v353_v21  ;;  %v1471_v24 = vpack.c.bf16 %v1000_v23, %v999_v22  ;;  %857 = vrot.lane.b32.xlu1 %v2014_v18, %s1643_s24  ;;  %v1645_v23 = vmov 0  }
  0xd5   : > { %855 = vrot.lane.b32.xlu0 %v2017_v19, %s1643_s24  ;;  %1580 = vset.pattern.permute.xlu1 %v1645_v23 }
  0xd6   : > { %1473 = vmatprep.subr.msk.bf16.mxu0 %vm1951_vm10, %v1471_v24  ;;  %v455_v29 = vpop.permute.xlu1 %454  ;;  %1579 = vset.pattern.permute.xlu0 %v1645_v23 }
  0xd7   : > { %v453_v30 = vpop.permute.xlu0 %452  ;;  %1476 = vmatpush3.bf16.xpose.msk.msra.mxu0 %vm1951_vm10, %v1471_v24  ;;  %498 = vst.msk [vmem:[#allocation2 + $0x28] sm:$0xff] %vm492_vm3, %v455_v29 }
  0xd8   : > { %497 = vst.msk [vmem:[#allocation2 + $0x20] sm:$0xff] %vm492_vm3, %v453_v30  ;;  %954 = vrot.lane.b32.xlu1 %v2028_v25, %s1644_s25 }
  0xd9   : > { %952 = vrot.lane.b32.xlu0 %v2031_v28, %s1644_s25 }
  0xda   : > { %v552_v31 = vpop.permute.xlu1 %551 }
  0xdb   : > { %v550_v32 = vpop.permute.xlu0 %549  ;;  %595 = vst.msk [vmem:[#allocation2 + $0x28] sm:$0xff] %vm589_vm4, %v552_v31 }
  0xdc   : > { %594 = vst.msk [vmem:[#allocation2 + $0x20] sm:$0xff] %vm589_vm4, %v550_v32  ;;  %273 = vrot.lane.b32.xlu1 %v1944_v58, %s1638_s9 }
  0xdd   : > { %271 = vrot.lane.b32.xlu0 %v1947_v59, %s1638_s9 }
  0xde   : > { %v649_v33 = vpop.permute.xlu1 %648 }
  0xdf   : > { %v647_v34 = vpop.permute.xlu0 %646  ;;  %692 = vst.msk [vmem:[#allocation2 + $0x28] sm:$0xff] %vm686_vm5, %v649_v33 }
  0xe0   : > { %691 = vst.msk [vmem:[#allocation2 + $0x20] sm:$0xff] %vm686_vm5, %v647_v34  ;;  %370 = vrot.lane.b32.xlu1 %v1964_v2, %s1637_s8  ;;  %v1355_v2 = vld [vmem:[%s1731_s7 + $0xd8] sm:$0xff] }
  0xe1   : > { %368 = vrot.lane.b32.xlu0 %v1967_v3, %s1637_s8 }
  0xe2   : > { %v749_v35 = vpop.permute.xlu1 %748 }
  0xe3   : > { %v747_v36 = vpop.permute.xlu0 %746  ;;  %792 = vst.msk [vmem:[#allocation2 + $0x28] sm:$0xff] %vm786_vm6, %v749_v35 }
  0xe4   : > { %791 = vst.msk [vmem:[#allocation2 + $0x20] sm:$0xff] %vm786_vm6, %v747_v36  ;;  %470 = vrot.lane.b32.xlu1 %v1824_v26, %s1639_s10  ;;  %v1354_v26 = vld [vmem:[%s1731_s7 + $0xc8] sm:$0xff] }
  0xe5   : > { %468 = vrot.lane.b32.xlu0 %v1827_v27, %s1639_s10  ;;  %v1353_v27 = vld [vmem:[%s1731_s7 + $0xc0] sm:$0xff] }
  0xe6   : > { %v846_v37 = vpop.permute.xlu1 %845 }
  0xe7   : > { %v844_v38 = vpop.permute.xlu0 %843  ;;  %889 = vst.msk [vmem:[#allocation2 + $0x28] sm:$0xff] %vm883_vm7, %v846_v37 }
  0xe8   : > { %888 = vst.msk [vmem:[#allocation2 + $0x20] sm:$0xff] %vm883_vm7, %v844_v38  ;;  %567 = vrot.lane.b32.xlu1 %v2014_v18, %s1640_s11 }
  0xe9   : > { %565 = vrot.lane.b32.xlu0 %v2017_v19, %s1640_s11 }
  0xea   : > { %v943_v39 = vpop.permute.xlu1 %942 }
  0xeb   : > { %v941_v40 = vpop.permute.xlu0 %940  ;;  %986 = vst.msk [vmem:[#allocation2 + $0x28] sm:$0xff] %vm980_vm8, %v943_v39 }
  0xec   : > { %985 = vst.msk [vmem:[#allocation2 + $0x20] sm:$0xff] %vm980_vm8, %v941_v40  ;;  %664 = vrot.lane.b32.xlu1 %v2028_v25, %s1641_s21 }
  0xed   : > { %662 = vrot.lane.b32.xlu0 %v2031_v28, %s1641_s21 }
  0xee   : > { %v262_v41 = vpop.permute.xlu1 %261 }
  0xef   : > { %v260_v42 = vpop.permute.xlu0 %259  ;;  %303 = vst.msk [vmem:[#allocation2 + $0x38] sm:$0xff] %vm295_vm1, %v262_v41 }
  0xf0   : > { %302 = vst.msk [vmem:[#allocation2 + $0x30] sm:$0xff] %vm295_vm1, %v260_v42  ;;  %764 = vrot.lane.b32.xlu1 %v1354_v26, %s1642_s22 }
  0xf1   : > { %762 = vrot.lane.b32.xlu0 %v1353_v27, %s1642_s22 }
  0xf2   : > { %v359_v45 = vpop.permute.xlu1 %358  ;;  %v1002_v48 = vld [vmem:[#allocation2 + $0x28] sm:$0xff] }
  0xf3   : > { %v357_v46 = vpop.permute.xlu0 %356  ;;  %v1001_v47 = vld [vmem:[#allocation2 + $0x20] sm:$0xff]  ;;  %400 = vst.msk [vmem:[#allocation2 + $0x38] sm:$0xff] %vm392_vm2, %v359_v45 }
  0xf4   : > { %399 = vst.msk [vmem:[#allocation2 + $0x30] sm:$0xff] %vm392_vm2, %v357_v46  ;;  %v1477_v49 = vpack.c.bf16 %v1002_v48, %v1001_v47  ;;  %861 = vrot.lane.b32.xlu1 %v1370_v43, %s1643_s24 }
  0xf5   : > { %859 = vrot.lane.b32.xlu0 %v1369_v44, %s1643_s24 }
  0xf6   : > { %1479 = vmatprep.subr.msk.bf16.mxu0 %vm1951_vm10, %v1477_v49  ;;  %v459_v52 = vpop.permute.xlu1 %458 }
  0xf7   : > { %v457_v53 = vpop.permute.xlu0 %456  ;;  %1482 = vmatpush3.bf16.xpose.msk.msra.mxu0 %vm1951_vm10, %v1477_v49  ;;  %500 = vst.msk [vmem:[#allocation2 + $0x38] sm:$0xff] %vm492_vm3, %v459_v52 }
  0xf8   : > { %499 = vst.msk [vmem:[#allocation2 + $0x30] sm:$0xff] %vm492_vm3, %v457_v53  ;;  %958 = vrot.lane.b32.xlu1 %v1386_v50, %s1644_s25 }
  0xf9   : > { %956 = vrot.lane.b32.xlu0 %v1385_v51, %s1644_s25 }
  0xfa   : > { %v556_v54 = vpop.permute.xlu1 %555 }
  0xfb   : > { %v554_v55 = vpop.permute.xlu0 %553  ;;  %597 = vst.msk [vmem:[#allocation2 + $0x38] sm:$0xff] %vm589_vm4, %v556_v54 }
  0xfc   : > { %596 = vst.msk [vmem:[#allocation2 + $0x30] sm:$0xff] %vm589_vm4, %v554_v55  ;;  %277 = vrot.lane.b32.xlu1 %v2014_v18, %s1638_s9 }
  0xfd   : > { %275 = vrot.lane.b32.xlu0 %v2017_v19, %s1638_s9  ;;  %v1016_v19 = vld [vmem:[%s2258_s2 + $0x8] sm:$0xff] }
  0xfe   : > { %v653_v56 = vpop.permute.xlu1 %652 }
  0xff   : > { %v651_v57 = vpop.permute.xlu0 %650  ;;  %694 = vst.msk [vmem:[#allocation2 + $0x38] sm:$0xff] %vm686_vm5, %v653_v56 }
 0x100   : > { %693 = vst.msk [vmem:[#allocation2 + $0x30] sm:$0xff] %vm686_vm5, %v651_v57  ;;  %374 = vrot.lane.b32.xlu1 %v2028_v25, %s1637_s8 }
 0x101   : > { %372 = vrot.lane.b32.xlu0 %v2031_v28, %s1637_s8  ;;  %s171_s8 = sand.u32 1, %s1611_s12  }
 0x102   : > { %v753_v58 = vpop.permute.xlu1 %752  ;;  %s1285_s9 = sshll.u32 %s171_s8, 4 }
 0x103   : > { %v751_v59 = vpop.permute.xlu0 %750  ;;  %794 = vst.msk [vmem:[#allocation2 + $0x38] sm:$0xff] %vm786_vm6, %v753_v58 }
 0x104   : > { %793 = vst.msk [vmem:[#allocation2 + $0x30] sm:$0xff] %vm786_vm6, %v751_v59  ;;  %474 = vrot.lane.b32.xlu1 %v1354_v26, %s1639_s10 }
 0x105   : > { %472 = vrot.lane.b32.xlu0 %v1353_v27, %s1639_s10  ;;  %s173_s10 = scalar_lea.vmem [#allocation3], %s1285_s9 }
 0x106   : > { %v850_v60 = vpop.permute.xlu1 %849 }
 0x107   : > { %v848_v61 = vpop.permute.xlu0 %847  ;;  %891 = vst.msk [vmem:[#allocation2 + $0x38] sm:$0xff] %vm883_vm7, %v850_v60 }
 0x108   : > { %890 = vst.msk [vmem:[#allocation2 + $0x30] sm:$0xff] %vm883_vm7, %v848_v61  ;;  %571 = vrot.lane.b32.xlu1 %v1370_v43, %s1640_s11 }
 0x109   : > { %569 = vrot.lane.b32.xlu0 %v1369_v44, %s1640_s11  ;;  %s1408_s11 = sshll.u32 (%p1712_p5), %s1623_s15, 2 }
 0x10a   : > { %v947_v62 = vpop.permute.xlu1 %946 }
 0x10b   : > { %v945_v63 = vpop.permute.xlu0 %944  ;;  %988 = vst.msk [vmem:[#allocation2 + $0x38] sm:$0xff] %vm980_vm8, %v947_v62 }
 0x10c   : > { %987 = vst.msk [vmem:[#allocation2 + $0x30] sm:$0xff] %vm980_vm8, %v945_v63  ;;  %668 = vrot.lane.b32.xlu1 %v1386_v50, %s1641_s21 }
 0x10d   : > { %666 = vrot.lane.b32.xlu0 %v1385_v51, %s1641_s21  ;;  %s1167_s21 = sadd.s32 (%p1712_p5), %s1619_s14, %s1408_s11 }
 0x10e   : > { %v266_v3 = vpop.permute.xlu1 %265  ;;  %s1409_s12 = sshll.u32 (%p1712_p5), %s1167_s21, 3 }
 0x10f   : > { %v264_v4 = vpop.permute.xlu0 %263  ;;  %305 = vst.msk [vmem:[#allocation2 + $0x48] sm:$0xff] %vm295_vm1, %v266_v3 }
 0x110   : > { %304 = vst.msk [vmem:[#allocation2 + $0x40] sm:$0xff] %vm295_vm1, %v264_v4  ;;  %768 = vrot.lane.b32.xlu1 %v1356_v1, %s1642_s22 }
 0x111   : > { %766 = vrot.lane.b32.xlu0 %v1355_v2, %s1642_s22 }
 0x112   : > { %v363_v7 = vpop.permute.xlu1 %362  ;;  %v1004_v10 = vld [vmem:[#allocation2 + $0x38] sm:$0xff] }
 0x113   : > { %v361_v8 = vpop.permute.xlu0 %360  ;;  %v1003_v9 = vld [vmem:[#allocation2 + $0x30] sm:$0xff]  ;;  %402 = vst.msk [vmem:[#allocation2 + $0x48] sm:$0xff] %vm392_vm2, %v363_v7 }
 0x114   : > { %401 = vst.msk [vmem:[#allocation2 + $0x40] sm:$0xff] %vm392_vm2, %v361_v8  ;;  %v1483_v11 = vpack.c.bf16 %v1004_v10, %v1003_v9  ;;  %865 = vrot.lane.b32.xlu1 %v1372_v5, %s1643_s24 }
 0x115   : > { %863 = vrot.lane.b32.xlu0 %v1371_v6, %s1643_s24 }
 0x116   : > { %1485 = vmatprep.subr.msk.bf16.mxu0 %vm1951_vm10, %v1483_v11  ;;  %v463_v14 = vpop.permute.xlu1 %462 }
 0x117   : > { %v461_v15 = vpop.permute.xlu0 %460  ;;  %1488 = vmatpush3.bf16.xpose.msk.msra.mxu0 %vm1951_vm10, %v1483_v11  ;;  %502 = vst.msk [vmem:[#allocation2 + $0x48] sm:$0xff] %vm492_vm3, %v463_v14 }
 0x118   : > { %501 = vst.msk [vmem:[#allocation2 + $0x40] sm:$0xff] %vm492_vm3, %v461_v15  ;;  %962 = vrot.lane.b32.xlu1 %v1388_v12, %s1644_s25 }
 0x119   : > { %960 = vrot.lane.b32.xlu0 %v1387_v13, %s1644_s25  ;;  %s1169_s25 = scalar_lea.vmem (%p1712_p5), %s2259_s3, %s1409_s12 }
 0x11a   : > { %v560_v17 = vpop.permute.xlu1 %559 }
 0x11b   : > { %v558_v18 = vpop.permute.xlu0 %557  ;;  %599 = vst.msk [vmem:[#allocation2 + $0x48] sm:$0xff] %vm589_vm4, %v560_v17 }
 0x11c   : > { %598 = vst.msk [vmem:[#allocation2 + $0x40] sm:$0xff] %vm589_vm4, %v558_v18  ;;  %1024 = vperm.xlu1 %1580, %v1016_v19  }
 0x11d   : > { %1019 = vperm.xlu0 %1579, %v1015_v20  }
 0x11e   : > { %v657_v21 = vpop.permute.xlu1 %656 }
 0x11f   : > { %v655_v22 = vpop.permute.xlu0 %654  ;;  %696 = vst.msk [vmem:[#allocation2 + $0x48] sm:$0xff] %vm686_vm5, %v657_v21 }
 0x120   : > { %695 = vst.msk [vmem:[#allocation2 + $0x40] sm:$0xff] %vm686_vm5, %v655_v22 }
 0x122   : > { %v757_v24 = vpop.permute.xlu1 %756 }
 0x123   : > { %v755_v25 = vpop.permute.xlu0 %754  ;;  %796 = vst.msk [vmem:[#allocation2 + $0x48] sm:$0xff] %vm786_vm6, %v757_v24 }
 0x124   : > { %795 = vst.msk [vmem:[#allocation2 + $0x40] sm:$0xff] %vm786_vm6, %v755_v25 }
 0x126   : > { %v854_v28 = vpop.permute.xlu1 %853 }
 0x127   : > { %v852_v29 = vpop.permute.xlu0 %851  ;;  %893 = vst.msk [vmem:[#allocation2 + $0x48] sm:$0xff] %vm883_vm7, %v854_v28 }
 0x128   : > { %892 = vst.msk [vmem:[#allocation2 + $0x40] sm:$0xff] %vm883_vm7, %v852_v29  ;;  %v1014_v29 = vld [vmem:[%s2257_s1 + $0x8] sm:$0xff] }
 0x12a   : > { %v951_v30 = vpop.permute.xlu1 %950 }
 0x12b   : > { %v949_v31 = vpop.permute.xlu0 %948  ;;  %990 = vst.msk [vmem:[#allocation2 + $0x48] sm:$0xff] %vm980_vm8, %v951_v30 }
 0x12c   : > { %989 = vst.msk [vmem:[#allocation2 + $0x40] sm:$0xff] %vm980_vm8, %v949_v31 }
 0x12e   : > { %v270_v32 = vpop.permute.xlu1 %269 }
 0x12f   : > { %v268_v33 = vpop.permute.xlu0 %267  ;;  %307 = vst.msk [vmem:[#allocation2 + $0x58] sm:$0xff] %vm295_vm1, %v270_v32 }
 0x130   : > { %306 = vst.msk [vmem:[#allocation2 + $0x50] sm:$0xff] %vm295_vm1, %v268_v33 }
 0x132   : > { %v367_v34 = vpop.permute.xlu1 %366  ;;  %v1006_v37 = vld [vmem:[#allocation2 + $0x48] sm:$0xff] }
 0x133   : > { %v365_v35 = vpop.permute.xlu0 %364  ;;  %v1005_v36 = vld [vmem:[#allocation2 + $0x40] sm:$0xff]  ;;  %404 = vst.msk [vmem:[#allocation2 + $0x58] sm:$0xff] %vm392_vm2, %v367_v34 }
 0x134   : > { %403 = vst.msk [vmem:[#allocation2 + $0x50] sm:$0xff] %vm392_vm2, %v365_v35  ;;  %v1489_v38 = vpack.c.bf16 %v1006_v37, %v1005_v36 }
 0x136   : > { %1491 = vmatprep.subr.msk.bf16.mxu0 %vm1951_vm10, %v1489_v38  ;;  %v467_v39 = vpop.permute.xlu1 %466 }
 0x137   : > { %v465_v40 = vpop.permute.xlu0 %464  ;;  %1494 = vmatpush3.bf16.xpose.msk.msra.mxu0 %vm1951_vm10, %v1489_v38  ;;  %504 = vst.msk [vmem:[#allocation2 + $0x58] sm:$0xff] %vm492_vm3, %v467_v39 }
 0x138   : > { %503 = vst.msk [vmem:[#allocation2 + $0x50] sm:$0xff] %vm492_vm3, %v465_v40 }
 0x13a   : > { %v564_v26 = vpop.permute.xlu1 %563 }
 0x13b   : > { %v562_v27 = vpop.permute.xlu0 %561  ;;  %601 = vst.msk [vmem:[#allocation2 + $0x58] sm:$0xff] %vm589_vm4, %v564_v26 }
 0x13c   : > { %600 = vst.msk [vmem:[#allocation2 + $0x50] sm:$0xff] %vm589_vm4, %v562_v27 }
 0x13e   : > { %v661_v41 = vpop.permute.xlu1 %660 }
 0x13f   : > { %v659_v42 = vpop.permute.xlu0 %658  ;;  %698 = vst.msk [vmem:[#allocation2 + $0x58] sm:$0xff] %vm686_vm5, %v661_v41 }
 0x140   : > { %697 = vst.msk [vmem:[#allocation2 + $0x50] sm:$0xff] %vm686_vm5, %v659_v42 }
 0x142   : > { %v761_v43 = vpop.permute.xlu1 %760 }
 0x143   : > { %v759_v44 = vpop.permute.xlu0 %758  ;;  %798 = vst.msk [vmem:[#allocation2 + $0x58] sm:$0xff] %vm786_vm6, %v761_v43 }
 0x144   : > { %797 = vst.msk [vmem:[#allocation2 + $0x50] sm:$0xff] %vm786_vm6, %v759_v44 }
 0x146   : > { %v858_v45 = vpop.permute.xlu1 %857 }
 0x147   : > { %v856_v46 = vpop.permute.xlu0 %855  ;;  %895 = vst.msk [vmem:[#allocation2 + $0x58] sm:$0xff] %vm883_vm7, %v858_v45 }
 0x148   : > { %894 = vst.msk [vmem:[#allocation2 + $0x50] sm:$0xff] %vm883_vm7, %v856_v46 }
 0x14a   : > { %v955_v47 = vpop.permute.xlu1 %954 }
 0x14b   : > { %v953_v48 = vpop.permute.xlu0 %952  ;;  %992 = vst.msk [vmem:[#allocation2 + $0x58] sm:$0xff] %vm980_vm8, %v955_v47 }
 0x14c   : > { %991 = vst.msk [vmem:[#allocation2 + $0x50] sm:$0xff] %vm980_vm8, %v953_v48 }
 0x14e   : > { %v274_v49 = vpop.permute.xlu1 %273 }
 0x14f   : > { %v272_v50 = vpop.permute.xlu0 %271  ;;  %309 = vst.msk [vmem:[#allocation2 + $0x68] sm:$0xff] %vm295_vm1, %v274_v49 }
 0x150   : > { %308 = vst.msk [vmem:[#allocation2 + $0x60] sm:$0xff] %vm295_vm1, %v272_v50 }
 0x152   : > { %v371_v51 = vpop.permute.xlu1 %370  ;;  %v1008_v54 = vld [vmem:[#allocation2 + $0x58] sm:$0xff] }
 0x153   : > { %v369_v52 = vpop.permute.xlu0 %368  ;;  %v1007_v53 = vld [vmem:[#allocation2 + $0x50] sm:$0xff]  ;;  %406 = vst.msk [vmem:[#allocation2 + $0x68] sm:$0xff] %vm392_vm2, %v371_v51 }
 0x154   : > { %405 = vst.msk [vmem:[#allocation2 + $0x60] sm:$0xff] %vm392_vm2, %v369_v52  ;;  %v1495_v55 = vpack.c.bf16 %v1008_v54, %v1007_v53 }
 0x156   : > { %1497 = vmatprep.subr.msk.bf16.mxu0 %vm1951_vm10, %v1495_v55  ;;  %v471_v56 = vpop.permute.xlu1 %470 }
 0x157   : > { %v469_v57 = vpop.permute.xlu0 %468  ;;  %1500 = vmatpush3.bf16.xpose.msk.msra.mxu0 %vm1951_vm10, %v1495_v55  ;;  %506 = vst.msk [vmem:[#allocation2 + $0x68] sm:$0xff] %vm492_vm3, %v471_v56 }
 0x158   : > { %505 = vst.msk [vmem:[#allocation2 + $0x60] sm:$0xff] %vm492_vm3, %v469_v57 }
 0x15a   : > { %v568_v58 = vpop.permute.xlu1 %567 }
 0x15b   : > { %v566_v59 = vpop.permute.xlu0 %565  ;;  %603 = vst.msk [vmem:[#allocation2 + $0x68] sm:$0xff] %vm589_vm4, %v568_v58 }
 0x15c   : > { %602 = vst.msk [vmem:[#allocation2 + $0x60] sm:$0xff] %vm589_vm4, %v566_v59 }
 0x15e   : > { %v665_v60 = vpop.permute.xlu1 %664 }
 0x15f   : > { %v663_v61 = vpop.permute.xlu0 %662  ;;  %700 = vst.msk [vmem:[#allocation2 + $0x68] sm:$0xff] %vm686_vm5, %v665_v60 }
 0x160   : > { %699 = vst.msk [vmem:[#allocation2 + $0x60] sm:$0xff] %vm686_vm5, %v663_v61 }
 0x162   : > { %v765_v62 = vpop.permute.xlu1 %764 }
 0x163   : > { %v763_v63 = vpop.permute.xlu0 %762  ;;  %800 = vst.msk [vmem:[#allocation2 + $0x68] sm:$0xff] %vm786_vm6, %v765_v62 }
 0x164   : > { %799 = vst.msk [vmem:[#allocation2 + $0x60] sm:$0xff] %vm786_vm6, %v763_v63 }
 0x166   : > { %v862_v1 = vpop.permute.xlu1 %861 }
 0x167   : > { %v860_v2 = vpop.permute.xlu0 %859  ;;  %897 = vst.msk [vmem:[#allocation2 + $0x68] sm:$0xff] %vm883_vm7, %v862_v1 }
 0x168   : > { %896 = vst.msk [vmem:[#allocation2 + $0x60] sm:$0xff] %vm883_vm7, %v860_v2 }
 0x16a   : > { %v959_v3 = vpop.permute.xlu1 %958 }
 0x16b   : > { %v957_v4 = vpop.permute.xlu0 %956  ;;  %994 = vst.msk [vmem:[#allocation2 + $0x68] sm:$0xff] %vm980_vm8, %v959_v3 }
 0x16c   : > { %993 = vst.msk [vmem:[#allocation2 + $0x60] sm:$0xff] %vm980_vm8, %v957_v4 }
 0x16e   : > { %v278_v5 = vpop.permute.xlu1 %277 }
 0x16f   : > { %v276_v6 = vpop.permute.xlu0 %275  ;;  %311 = vst.msk [vmem:[#allocation2 + $0x78] sm:$0xff] %vm295_vm1, %v278_v5 }
 0x170   : > { %310 = vst.msk [vmem:[#allocation2 + $0x70] sm:$0xff] %vm295_vm1, %v276_v6 }
 0x172   : > { %v375_v7 = vpop.permute.xlu1 %374  ;;  %v1010_v10 = vld [vmem:[#allocation2 + $0x68] sm:$0xff] }
 0x173   : > { %v373_v8 = vpop.permute.xlu0 %372  ;;  %v1009_v9 = vld [vmem:[#allocation2 + $0x60] sm:$0xff]  ;;  %408 = vst.msk [vmem:[#allocation2 + $0x78] sm:$0xff] %vm392_vm2, %v375_v7 }
 0x174   : > { %407 = vst.msk [vmem:[#allocation2 + $0x70] sm:$0xff] %vm392_vm2, %v373_v8  ;;  %v1501_v11 = vpack.c.bf16 %v1010_v10, %v1009_v9 }
 0x176   : > { %1503 = vmatprep.subr.msk.bf16.mxu0 %vm1951_vm10, %v1501_v11  ;;  %v475_v12 = vpop.permute.xlu1 %474 }
 0x177   : > { %v473_v13 = vpop.permute.xlu0 %472  ;;  %1506 = vmatpush3.bf16.xpose.msk.msra.mxu0 %vm1951_vm10, %v1501_v11  ;;  %508 = vst.msk [vmem:[#allocation2 + $0x78] sm:$0xff] %vm492_vm3, %v475_v12 }
 0x178   : > { %507 = vst.msk [vmem:[#allocation2 + $0x70] sm:$0xff] %vm492_vm3, %v473_v13 }
 0x17a   : > { %v572_v14 = vpop.permute.xlu1 %571 }
 0x17b   : > { %v570_v15 = vpop.permute.xlu0 %569  ;;  %605 = vst.msk [vmem:[#allocation2 + $0x78] sm:$0xff] %vm589_vm4, %v572_v14 }
 0x17c   : > { %604 = vst.msk [vmem:[#allocation2 + $0x70] sm:$0xff] %vm589_vm4, %v570_v15 }
 0x17e   : > { %v669_v16 = vpop.permute.xlu1 %668 }
 0x17f   : > { %v667_v17 = vpop.permute.xlu0 %666  ;;  %702 = vst.msk [vmem:[#allocation2 + $0x78] sm:$0xff] %vm686_vm5, %v669_v16 }
 0x180   : > { %701 = vst.msk [vmem:[#allocation2 + $0x70] sm:$0xff] %vm686_vm5, %v667_v17 }
 0x182   : > { %v769_v18 = vpop.permute.xlu1 %768 }
 0x183   : > { %v767_v19 = vpop.permute.xlu0 %766  ;;  %802 = vst.msk [vmem:[#allocation2 + $0x78] sm:$0xff] %vm786_vm6, %v769_v18 }
 0x184   : > { %801 = vst.msk [vmem:[#allocation2 + $0x70] sm:$0xff] %vm786_vm6, %v767_v19 }
 0x186   : > { %v866_v20 = vpop.permute.xlu1 %865 }
 0x187   : > { %v864_v21 = vpop.permute.xlu0 %863  ;;  %899 = vst.msk [vmem:[#allocation2 + $0x78] sm:$0xff] %vm883_vm7, %v866_v20 }
 0x188   : > { %898 = vst.msk [vmem:[#allocation2 + $0x70] sm:$0xff] %vm883_vm7, %v864_v21 }
 0x18a   : > { %v963_v22 = vpop.permute.xlu1 %962 }
 0x18b   : > { %v961_v23 = vpop.permute.xlu0 %960  ;;  %996 = vst.msk [vmem:[#allocation2 + $0x78] sm:$0xff] %vm980_vm8, %v963_v22 }
 0x18c   : > { %995 = vst.msk [vmem:[#allocation2 + $0x70] sm:$0xff] %vm980_vm8, %v961_v23 }
 0x192   : > { %v1012_v25 = vld [vmem:[#allocation2 + $0x78] sm:$0xff] }
 0x193   : > { %v1011_v24 = vld [vmem:[#allocation2 + $0x70] sm:$0xff] }
 0x194   : > { %v1507_v28 = vpack.c.bf16 %v1012_v25, %v1011_v24 }
 0x196   : > { %1509 = vmatprep.subr.msk.bf16.mxu0 %vm1951_vm10, %v1507_v28 }
 0x197   : > { %1512 = vmatpush3.bf16.xpose.msk.msra.mxu0 %vm1951_vm10, %v1507_v28 }
 0x19b   : > { %v1025_v30 = vpop.permute.xlu1 %1024 }
 0x19c   : > { %v1020_v31 = vpop.permute.xlu0 %1019 }
 0x19e   : > { %1463 = vmatmul.mubr.msk.f32.vlgmr.msra.gmra.mrb[0].mxu0 %vm1027_vm9, %v1014_v29 }
 0x26f   : > { %1165 = sbr.rel (!%p1712_p5) target bundleno = 638 (0x27e), region = 36 }
 0x271   : > { %v1464_v32 = vpop.f32.mrb[0].mxu0 }
 0x272   : > { %v1154_v33 = vadd.f32 %v1464_v32, %v1025_v30  ;;  %v1148_v34 = vpop.f32.mrb[1].mxu0 }
 0x273   : > { %v1149_v35 = vadd.f32 %v1148_v34, %v1020_v31 }
 0x274   : > { %1158 = vst [vmem:[%s173_s10 + $0x8] sm:$0xff] %v1154_v33 }
 0x275   : > { %1157 = vst [vmem:[%s173_s10] sm:$0xff] %v1149_v35 }
 0x27b   : > { %v1201_v36 = vld [vmem:[%s173_s10 + $0x8] sm:$0xff] }
 0x27c   : > { %v1199_v0 = vld [vmem:[%s173_s10] sm:$0xff]  ;;  %1202 = vst [vmem:[%s1169_s25 + $0x10] sm:$0xff] %v1201_v36 }
 0x27d   : > { %1200 = vst [vmem:[%s1169_s25] sm:$0xff] %v1199_v0 }
 0x27e PF: > { %s13_s18 = sadd.s32 1, %s1635_s18   ;;  %s2263_s12 = smov %s1615_s13 }
 0x27f   : > { %p10_p10 = scmp.ge.s32.totalorder %s13_s18, 6   ;;  %s2264_s13 = smov %s1723_s27 }
 0x280   : > { %s2265_s14 = smov %s1627_s16  ;;  %s2266_s15 = smov %s1631_s17 }
 0x281   : > { %s2267_s16 = smov %s2270_s19  ;;  %s2268_s17 = smov %s2274_s20 }
 0x282   :  { %12 = sbr.rel (!%p10_p10) target bundleno = 4 (0x4), region = 103 }

</bundles_post_ra>
